<compile_context>
chip_gen: v5e
topology: v5e:2x2
jax: 0.10.0
libtpu: 0.0.40
codegen_flags: <defaults>
</compile_context>

<pallas_src>
import functools

import jax
import jax.numpy as jnp
from jax.experimental import pallas as pl
from jax.experimental.pallas import tpu as pltpu


def _round_up(x, m):
    return ((x + m - 1) // m) * m


_GATHER_DEPTH = 8     # outstanding embedding-row DMAs per grid step
_MXU_MIN_LANES = 128  # pad small feature dims to a full lane width


# ----------------------------------------------------------------------------
# One-time parameter preprocessing (init-time, NOT per forward call)
# ----------------------------------------------------------------------------
def prepare_params(params):
    """Pad hidden -> multiple of 128 (lane dense), num_img_dim -> 128, and
    pre-cast MXU weight operands to bf16.  Exact math: all padding is zeros."""
    emb_table = params["emb_table"]
    w_vis, b_vis = params["w_vis"], params["b_vis"]
    w_proj, b_proj = params["w_proj"], params["b_proj"]

    hidden = emb_table.shape[1]
    hp = _round_up(hidden, 128)
    num_img_dim = w_vis.shape[1]
    nip = _round_up(max(num_img_dim, _MXU_MIN_LANES), 128)

    if hp != hidden:
        emb_table = jnp.pad(emb_table, ((0, 0), (0, hp - hidden)))
        w_proj = jnp.pad(w_proj, ((0, 0), (0, hp - hidden)))
        b_proj = jnp.pad(b_proj, ((0, 0), (0, hp - hidden)))
    if nip != num_img_dim:
        w_vis = jnp.pad(w_vis, ((0, 0), (0, nip - num_img_dim)))
        b_vis = jnp.pad(b_vis, ((0, 0), (0, nip - num_img_dim)))
        w_proj = jnp.pad(w_proj, ((0, nip - num_img_dim), (0, 0)))

    return {
        "emb_table": emb_table.astype(jnp.float32),   # gathered by DMA (exact)
        "w_vis": w_vis.astype(jnp.bfloat16),           # bf16 MXU operand
        "b_vis": b_vis.astype(jnp.float32),            # f32 bias
        "w_proj": w_proj.astype(jnp.bfloat16),         # bf16 MXU operand
        "b_proj": b_proj.astype(jnp.float32),          # f32 bias
        "hidden": hidden,
    }


# ----------------------------------------------------------------------------
# Fused kernel: per-batch embedding row gather + vision/projection + fused write
# ----------------------------------------------------------------------------
def _fused_embed_kernel(token_len, ids_ref, emb_hbm, img_ref,
                        w_vis_ref, b_vis_ref, w_proj_ref, b_proj_ref,
                        out_ref, emb_scratch, gather_sems):
    b = pl.program_id(0)
    depth = gather_sems.shape[0]

    def row_copy(t):
        # emb_table row for token t of batch b -> scratch row t
        return pltpu.make_async_copy(
            emb_hbm.at[ids_ref[b, t]], emb_scratch.at[t],
            gather_sems.at[t % depth])

    # --- text path: batched DMA row gather, up to `depth` copies in flight ---
    for t in range(min(depth, token_len)):
        row_copy(t).start()
    for t in range(depth, token_len):          # rotate semaphore slots
        row_copy(t - depth).wait()
        row_copy(t).start()

    # --- image path (MXU work overlaps the outstanding gather DMAs) ---------
    x = img_ref[0].astype(jnp.float32)          # (img_len, C, H*W), cast post-DMA
    feat = jnp.mean(x, axis=-1)                 # XLU spatial pool -> (img_len, C)
    vis = jnp.dot(feat.astype(jnp.bfloat16), w_vis_ref[...],
                  preferred_element_type=jnp.float32) + b_vis_ref[...]
    proj = jnp.dot(vis.astype(jnp.bfloat16), w_proj_ref[...],
                   preferred_element_type=jnp.float32) + b_proj_ref[...]
    img_out = jnp.maximum(proj, 0.0)            # ReLU, f32  (img_len, hp)

    # --- drain remaining gathers, then fused write (no XLA concat) ----------
    for t in range(max(token_len - depth, 0), token_len):
        row_copy(t).wait()
    out_ref[0, :token_len, :] = emb_scratch[...]
    out_ref[0, token_len:, :] = img_out


def fused_inputs_embeds(prepared, input_ids, images):
    """Returns (bz, token_len + img_len, hp) fused inputs_embeds (f32)."""
    bz, token_len = input_ids.shape
    _, img_len, C, H, W = images.shape
    HW = H * W
    emb_table = prepared["emb_table"]
    hp = emb_table.shape[1]
    nip = prepared["w_vis"].shape[1]
    total_len = token_len + img_len

    ids = input_ids.astype(jnp.int32)
    imgs = images.reshape(bz, img_len, C, HW)   # layout-compatible reshape only
    depth = max(1, min(_GATHER_DEPTH, token_len))

    kernel = functools.partial(_fused_embed_kernel, token_len)

    return pl.pallas_call(
        kernel,
        out_shape=jax.ShapeDtypeStruct((bz, total_len, hp), jnp.float32),
        grid_spec=pltpu.PrefetchScalarGridSpec(
            num_scalar_prefetch=1,                      # ids -> SMEM
            grid=(bz,),
            in_specs=[
                # embedding table stays in HBM; rows are DMA-gathered manually
                pl.BlockSpec(memory_space=pl.ANY),
                # per-batch image block, auto double-buffered across the grid
                pl.BlockSpec((1, img_len, C, HW), lambda b, ids: (b, 0, 0, 0)),
                # weights / biases stay VMEM-resident across all grid steps
                pl.BlockSpec((C, nip), lambda b, ids: (0, 0)),
                pl.BlockSpec((1, nip), lambda b, ids: (0, 0)),
                pl.BlockSpec((nip, hp), lambda b, ids: (0, 0)),
                pl.BlockSpec((1, hp), lambda b, ids: (0, 0)),
            ],
            out_specs=pl.BlockSpec((1, total_len, hp), lambda b, ids: (b, 0, 0)),
            scratch_shapes=[
                pltpu.VMEM((token_len, hp), jnp.float32),    # gathered rows
                pltpu.SemaphoreType.DMA((depth,)),           # >= 8 in flight
            ],
        ),
        compiler_params=pltpu.CompilerParams(
            dimension_semantics=("parallel",),     # v7x: 2 TCs split batches
            vmem_limit_bytes=32 * 1024 * 1024),    # explicit for v5e's 16 MiB default
    )(ids, emb_table, imgs, prepared["w_vis"], prepared["b_vis"],
      prepared["w_proj"], prepared["b_proj"])


# ----------------------------------------------------------------------------
# Forward
# ----------------------------------------------------------------------------
def naive_multimodal_forward(prepared, inputs):
    bz, _ = inputs["input_ids"].shape
    img_len = inputs["images"].shape[1]
    hidden = prepared["hidden"]

    fused = fused_inputs_embeds(prepared, inputs["input_ids"], inputs["images"])
    inputs_embeds = fused if fused.shape[-1] == hidden else fused[..., :hidden]

    img_mask = jnp.ones((bz, img_len), dtype=inputs["attention_mask"].dtype)
    attention_mask = jnp.concatenate([inputs["attention_mask"], img_mask],
                                     axis=-1)
    # TODO(synk): downstream self.language_model(**inputs) is an external
    # HuggingFace transformer and is not reproduced here; we return the fused
    # inputs_embeds / attention_mask that would be fed into it.
    return inputs_embeds, attention_mask


# ----------------------------------------------------------------------------
# Reference (plain JAX, f32) for a correctness sanity check
# ----------------------------------------------------------------------------
def reference_forward(params, inputs):
    emb = params["emb_table"][inputs["input_ids"]]                     # gather
    bz, img_len = inputs["images"].shape[:2]
    feat = jnp.mean(inputs["images"].astype(jnp.float32), axis=(-1, -2))
    vis = feat @ params["w_vis"] + params["b_vis"][0]
    proj = jnp.maximum(vis @ params["w_proj"] + params["b_proj"][0], 0.0)
    inputs_embeds = jnp.concatenate([emb, proj], axis=1)
    mask = jnp.concatenate(
        [inputs["attention_mask"],
         jnp.ones((bz, img_len), dtype=inputs["attention_mask"].dtype)],
        axis=-1)
    return inputs_embeds, mask


# ----------------------------------------------------------------------------
if __name__ == "__main__":
    # small shapes consistent with the module's forward
    bz, token_len, img_len = 2, 8, 2
    C, H, W = 4, 16, 16
    vocab, num_img_dim, hidden = 128, 64, 32

    key = jax.random.PRNGKey(0)
    k_emb, k_wv, k_bv, k_wp, k_bp, k_ids, k_img = jax.random.split(key, 7)

    params = {
        "emb_table": jax.random.normal(k_emb, (vocab, hidden), jnp.float32) * 0.02,
        "w_vis": jax.random.normal(k_wv, (C, num_img_dim), jnp.float32) * 0.1,
        "b_vis": jax.random.normal(k_bv, (1, num_img_dim), jnp.float32) * 0.1,
        "w_proj": jax.random.normal(k_wp, (num_img_dim, hidden), jnp.float32) * 0.1,
        "b_proj": jax.random.normal(k_bp, (1, hidden), jnp.float32) * 0.1,
    }

    inputs = {
        "input_ids": jax.random.randint(k_ids, (bz, token_len), 0, vocab, jnp.int32),
        "attention_mask": jnp.ones((bz, token_len), jnp.int32),
        "images": jax.random.normal(k_img, (bz, img_len, C, H, W), jnp.float32),
        "token_type_ids": None,
    }

    prepared = prepare_params(params)        # one-time init cost (pad / bf16 cast)

    embeds, mask = naive_multimodal_forward(prepared, inputs)
    embeds = jax.block_until_ready(embeds)
    mask = jax.block_until_ready(mask)

    ref_embeds, ref_mask = reference_forward(params, inputs)

    assert embeds.shape == (bz, token_len + img_len, hidden)
    assert mask.shape == (bz, token_len + img_len)
    # bf16 MXU inputs (f32 accumulation) -> loosened tolerance vs f32 reference
    assert jnp.allclose(embeds, ref_embeds, atol=2e-2, rtol=2e-2)
    assert jnp.array_equal(mask, ref_mask)

    print("KERNEL_OK")
</pallas_src>

<mosaic_0001>
module attributes {stable_mosaic.version = 11 : i64} {
  func.func @_fused_embed_kernel(%arg0: i32, %arg1: memref<2x8xi32, #tpu.memory_space<smem>>, %arg2: memref<128x128xf32, #tpu.memory_space<any>>, %arg3: memref<1x2x4x256xf32, #tpu.memory_space<vmem>>, %arg4: memref<4x128xbf16, #tpu.memory_space<vmem>>, %arg5: memref<1x128xf32, #tpu.memory_space<vmem>>, %arg6: memref<128x128xbf16, #tpu.memory_space<vmem>>, %arg7: memref<1x128xf32, #tpu.memory_space<vmem>>, %arg8: memref<1x10x128xf32, #tpu.memory_space<vmem>>, %arg9: memref<8x128xf32, #tpu.memory_space<vmem>>, %arg10: memref<8x!tpu.dma_semaphore, #tpu.memory_space<semaphore_mem>>) attributes {dimension_semantics = [#tpu.dimension_semantics<parallel>], iteration_bounds = array<i64: 2>, scalar_prefetch = 1 : i64, scratch_operands = 2 : i64, tpu.core_type = #tpu.core_type<tc>, window_params = [{}, {transform_indices = @transform_1, window_bounds = array<i64: 1, 2, 4, 256>}, {pipeline_mode = #tpu.pipeline_mode<synchronous>, transform_indices = @transform_2, window_bounds = array<i64: 4, 128>}, {pipeline_mode = #tpu.pipeline_mode<synchronous>, transform_indices = @transform_3, window_bounds = array<i64: 1, 128>}, {pipeline_mode = #tpu.pipeline_mode<synchronous>, transform_indices = @transform_4, window_bounds = array<i64: 128, 128>}, {pipeline_mode = #tpu.pipeline_mode<synchronous>, transform_indices = @transform_5, window_bounds = array<i64: 1, 128>}, {transform_indices = @transform_6, window_bounds = array<i64: 1, 10, 128>}]} {
    %0 = arith.index_cast %arg0 : i32 to index
    %c0 = arith.constant 0 : index
    %1 = memref.load %arg1[%0, %c0] : memref<2x8xi32, #tpu.memory_space<smem>>
    %c0_i32 = arith.constant 0 : i32
    %c0_i32_0 = arith.constant 0 : i32
    %c0_i32_1 = arith.constant 0 : i32
    %2 = tpu.memref_slice %arg2[%1, %c0_i32_1] : memref<128x128xf32, #tpu.memory_space<any>> -> memref<1x128xf32, #tpu.memory_space<any>>
    %3 = tpu.memref_squeeze %2 : memref<1x128xf32, #tpu.memory_space<any>> -> memref<128xf32, #tpu.memory_space<any>>
    %c0_i32_2 = arith.constant 0 : i32
    %4 = tpu.memref_slice %arg9[%c0_i32, %c0_i32_2] : memref<8x128xf32, #tpu.memory_space<vmem>> -> memref<1x128xf32, #tpu.memory_space<vmem>>
    %5 = tpu.memref_squeeze %4 : memref<1x128xf32, #tpu.memory_space<vmem>> -> memref<128xf32, #tpu.memory_space<vmem>>
    %6 = tpu.memref_slice %arg10[%c0_i32_0] : memref<8x!tpu.dma_semaphore, #tpu.memory_space<semaphore_mem>> -> memref<1x!tpu.dma_semaphore, #tpu.memory_space<semaphore_mem>>
    %7 = tpu.memref_squeeze %6 : memref<1x!tpu.dma_semaphore, #tpu.memory_space<semaphore_mem>> -> memref<!tpu.dma_semaphore, #tpu.memory_space<semaphore_mem>>
    tpu.enqueue_dma source(%3 : memref<128xf32, #tpu.memory_space<any>>) target(%5 : memref<128xf32, #tpu.memory_space<vmem>>) target_semaphore(%7 : memref<!tpu.dma_semaphore, #tpu.memory_space<semaphore_mem>>)
    %8 = arith.index_cast %arg0 : i32 to index
    %c1 = arith.constant 1 : index
    %9 = memref.load %arg1[%8, %c1] : memref<2x8xi32, #tpu.memory_space<smem>>
    %c1_i32 = arith.constant 1 : i32
    %c1_i32_3 = arith.constant 1 : i32
    %c0_i32_4 = arith.constant 0 : i32
    %10 = tpu.memref_slice %arg2[%9, %c0_i32_4] : memref<128x128xf32, #tpu.memory_space<any>> -> memref<1x128xf32, #tpu.memory_space<any>>
    %11 = tpu.memref_squeeze %10 : memref<1x128xf32, #tpu.memory_space<any>> -> memref<128xf32, #tpu.memory_space<any>>
    %c0_i32_5 = arith.constant 0 : i32
    %12 = tpu.memref_slice %arg9[%c1_i32, %c0_i32_5] : memref<8x128xf32, #tpu.memory_space<vmem>> -> memref<1x128xf32, #tpu.memory_space<vmem>>
    %13 = tpu.memref_squeeze %12 : memref<1x128xf32, #tpu.memory_space<vmem>> -> memref<128xf32, #tpu.memory_space<vmem>>
    %14 = tpu.memref_slice %arg10[%c1_i32_3] : memref<8x!tpu.dma_semaphore, #tpu.memory_space<semaphore_mem>> -> memref<1x!tpu.dma_semaphore, #tpu.memory_space<semaphore_mem>>
    %15 = tpu.memref_squeeze %14 : memref<1x!tpu.dma_semaphore, #tpu.memory_space<semaphore_mem>> -> memref<!tpu.dma_semaphore, #tpu.memory_space<semaphore_mem>>
    tpu.enqueue_dma source(%11 : memref<128xf32, #tpu.memory_space<any>>) target(%13 : memref<128xf32, #tpu.memory_space<vmem>>) target_semaphore(%15 : memref<!tpu.dma_semaphore, #tpu.memory_space<semaphore_mem>>)
    %16 = arith.index_cast %arg0 : i32 to index
    %c2 = arith.constant 2 : index
    %17 = memref.load %arg1[%16, %c2] : memref<2x8xi32, #tpu.memory_space<smem>>
    %c2_i32 = arith.constant 2 : i32
    %c2_i32_6 = arith.constant 2 : i32
    %c0_i32_7 = arith.constant 0 : i32
    %18 = tpu.memref_slice %arg2[%17, %c0_i32_7] : memref<128x128xf32, #tpu.memory_space<any>> -> memref<1x128xf32, #tpu.memory_space<any>>
    %19 = tpu.memref_squeeze %18 : memref<1x128xf32, #tpu.memory_space<any>> -> memref<128xf32, #tpu.memory_space<any>>
    %c0_i32_8 = arith.constant 0 : i32
    %20 = tpu.memref_slice %arg9[%c2_i32, %c0_i32_8] : memref<8x128xf32, #tpu.memory_space<vmem>> -> memref<1x128xf32, #tpu.memory_space<vmem>>
    %21 = tpu.memref_squeeze %20 : memref<1x128xf32, #tpu.memory_space<vmem>> -> memref<128xf32, #tpu.memory_space<vmem>>
    %22 = tpu.memref_slice %arg10[%c2_i32_6] : memref<8x!tpu.dma_semaphore, #tpu.memory_space<semaphore_mem>> -> memref<1x!tpu.dma_semaphore, #tpu.memory_space<semaphore_mem>>
    %23 = tpu.memref_squeeze %22 : memref<1x!tpu.dma_semaphore, #tpu.memory_space<semaphore_mem>> -> memref<!tpu.dma_semaphore, #tpu.memory_space<semaphore_mem>>
    tpu.enqueue_dma source(%19 : memref<128xf32, #tpu.memory_space<any>>) target(%21 : memref<128xf32, #tpu.memory_space<vmem>>) target_semaphore(%23 : memref<!tpu.dma_semaphore, #tpu.memory_space<semaphore_mem>>)
    %24 = arith.index_cast %arg0 : i32 to index
    %c3 = arith.constant 3 : index
    %25 = memref.load %arg1[%24, %c3] : memref<2x8xi32, #tpu.memory_space<smem>>
    %c3_i32 = arith.constant 3 : i32
    %c3_i32_9 = arith.constant 3 : i32
    %c0_i32_10 = arith.constant 0 : i32
    %26 = tpu.memref_slice %arg2[%25, %c0_i32_10] : memref<128x128xf32, #tpu.memory_space<any>> -> memref<1x128xf32, #tpu.memory_space<any>>
    %27 = tpu.memref_squeeze %26 : memref<1x128xf32, #tpu.memory_space<any>> -> memref<128xf32, #tpu.memory_space<any>>
    %c0_i32_11 = arith.constant 0 : i32
    %28 = tpu.memref_slice %arg9[%c3_i32, %c0_i32_11] : memref<8x128xf32, #tpu.memory_space<vmem>> -> memref<1x128xf32, #tpu.memory_space<vmem>>
    %29 = tpu.memref_squeeze %28 : memref<1x128xf32, #tpu.memory_space<vmem>> -> memref<128xf32, #tpu.memory_space<vmem>>
    %30 = tpu.memref_slice %arg10[%c3_i32_9] : memref<8x!tpu.dma_semaphore, #tpu.memory_space<semaphore_mem>> -> memref<1x!tpu.dma_semaphore, #tpu.memory_space<semaphore_mem>>
    %31 = tpu.memref_squeeze %30 : memref<1x!tpu.dma_semaphore, #tpu.memory_space<semaphore_mem>> -> memref<!tpu.dma_semaphore, #tpu.memory_space<semaphore_mem>>
    tpu.enqueue_dma source(%27 : memref<128xf32, #tpu.memory_space<any>>) target(%29 : memref<128xf32, #tpu.memory_space<vmem>>) target_semaphore(%31 : memref<!tpu.dma_semaphore, #tpu.memory_space<semaphore_mem>>)
    %32 = arith.index_cast %arg0 : i32 to index
    %c4 = arith.constant 4 : index
    %33 = memref.load %arg1[%32, %c4] : memref<2x8xi32, #tpu.memory_space<smem>>
    %c4_i32 = arith.constant 4 : i32
    %c4_i32_12 = arith.constant 4 : i32
    %c0_i32_13 = arith.constant 0 : i32
    %34 = tpu.memref_slice %arg2[%33, %c0_i32_13] : memref<128x128xf32, #tpu.memory_space<any>> -> memref<1x128xf32, #tpu.memory_space<any>>
    %35 = tpu.memref_squeeze %34 : memref<1x128xf32, #tpu.memory_space<any>> -> memref<128xf32, #tpu.memory_space<any>>
    %c0_i32_14 = arith.constant 0 : i32
    %36 = tpu.memref_slice %arg9[%c4_i32, %c0_i32_14] : memref<8x128xf32, #tpu.memory_space<vmem>> -> memref<1x128xf32, #tpu.memory_space<vmem>>
    %37 = tpu.memref_squeeze %36 : memref<1x128xf32, #tpu.memory_space<vmem>> -> memref<128xf32, #tpu.memory_space<vmem>>
    %38 = tpu.memref_slice %arg10[%c4_i32_12] : memref<8x!tpu.dma_semaphore, #tpu.memory_space<semaphore_mem>> -> memref<1x!tpu.dma_semaphore, #tpu.memory_space<semaphore_mem>>
    %39 = tpu.memref_squeeze %38 : memref<1x!tpu.dma_semaphore, #tpu.memory_space<semaphore_mem>> -> memref<!tpu.dma_semaphore, #tpu.memory_space<semaphore_mem>>
    tpu.enqueue_dma source(%35 : memref<128xf32, #tpu.memory_space<any>>) target(%37 : memref<128xf32, #tpu.memory_space<vmem>>) target_semaphore(%39 : memref<!tpu.dma_semaphore, #tpu.memory_space<semaphore_mem>>)
    %40 = arith.index_cast %arg0 : i32 to index
    %c5 = arith.constant 5 : index
    %41 = memref.load %arg1[%40, %c5] : memref<2x8xi32, #tpu.memory_space<smem>>
    %c5_i32 = arith.constant 5 : i32
    %c5_i32_15 = arith.constant 5 : i32
    %c0_i32_16 = arith.constant 0 : i32
    %42 = tpu.memref_slice %arg2[%41, %c0_i32_16] : memref<128x128xf32, #tpu.memory_space<any>> -> memref<1x128xf32, #tpu.memory_space<any>>
    %43 = tpu.memref_squeeze %42 : memref<1x128xf32, #tpu.memory_space<any>> -> memref<128xf32, #tpu.memory_space<any>>
    %c0_i32_17 = arith.constant 0 : i32
    %44 = tpu.memref_slice %arg9[%c5_i32, %c0_i32_17] : memref<8x128xf32, #tpu.memory_space<vmem>> -> memref<1x128xf32, #tpu.memory_space<vmem>>
    %45 = tpu.memref_squeeze %44 : memref<1x128xf32, #tpu.memory_space<vmem>> -> memref<128xf32, #tpu.memory_space<vmem>>
    %46 = tpu.memref_slice %arg10[%c5_i32_15] : memref<8x!tpu.dma_semaphore, #tpu.memory_space<semaphore_mem>> -> memref<1x!tpu.dma_semaphore, #tpu.memory_space<semaphore_mem>>
    %47 = tpu.memref_squeeze %46 : memref<1x!tpu.dma_semaphore, #tpu.memory_space<semaphore_mem>> -> memref<!tpu.dma_semaphore, #tpu.memory_space<semaphore_mem>>
    tpu.enqueue_dma source(%43 : memref<128xf32, #tpu.memory_space<any>>) target(%45 : memref<128xf32, #tpu.memory_space<vmem>>) target_semaphore(%47 : memref<!tpu.dma_semaphore, #tpu.memory_space<semaphore_mem>>)
    %48 = arith.index_cast %arg0 : i32 to index
    %c6 = arith.constant 6 : index
    %49 = memref.load %arg1[%48, %c6] : memref<2x8xi32, #tpu.memory_space<smem>>
    %c6_i32 = arith.constant 6 : i32
    %c6_i32_18 = arith.constant 6 : i32
    %c0_i32_19 = arith.constant 0 : i32
    %50 = tpu.memref_slice %arg2[%49, %c0_i32_19] : memref<128x128xf32, #tpu.memory_space<any>> -> memref<1x128xf32, #tpu.memory_space<any>>
    %51 = tpu.memref_squeeze %50 : memref<1x128xf32, #tpu.memory_space<any>> -> memref<128xf32, #tpu.memory_space<any>>
    %c0_i32_20 = arith.constant 0 : i32
    %52 = tpu.memref_slice %arg9[%c6_i32, %c0_i32_20] : memref<8x128xf32, #tpu.memory_space<vmem>> -> memref<1x128xf32, #tpu.memory_space<vmem>>
    %53 = tpu.memref_squeeze %52 : memref<1x128xf32, #tpu.memory_space<vmem>> -> memref<128xf32, #tpu.memory_space<vmem>>
    %54 = tpu.memref_slice %arg10[%c6_i32_18] : memref<8x!tpu.dma_semaphore, #tpu.memory_space<semaphore_mem>> -> memref<1x!tpu.dma_semaphore, #tpu.memory_space<semaphore_mem>>
    %55 = tpu.memref_squeeze %54 : memref<1x!tpu.dma_semaphore, #tpu.memory_space<semaphore_mem>> -> memref<!tpu.dma_semaphore, #tpu.memory_space<semaphore_mem>>
    tpu.enqueue_dma source(%51 : memref<128xf32, #tpu.memory_space<any>>) target(%53 : memref<128xf32, #tpu.memory_space<vmem>>) target_semaphore(%55 : memref<!tpu.dma_semaphore, #tpu.memory_space<semaphore_mem>>)
    %56 = arith.index_cast %arg0 : i32 to index
    %c7 = arith.constant 7 : index
    %57 = memref.load %arg1[%56, %c7] : memref<2x8xi32, #tpu.memory_space<smem>>
    %c7_i32 = arith.constant 7 : i32
    %c7_i32_21 = arith.constant 7 : i32
    %c0_i32_22 = arith.constant 0 : i32
    %58 = tpu.memref_slice %arg2[%57, %c0_i32_22] : memref<128x128xf32, #tpu.memory_space<any>> -> memref<1x128xf32, #tpu.memory_space<any>>
    %59 = tpu.memref_squeeze %58 : memref<1x128xf32, #tpu.memory_space<any>> -> memref<128xf32, #tpu.memory_space<any>>
    %c0_i32_23 = arith.constant 0 : i32
    %60 = tpu.memref_slice %arg9[%c7_i32, %c0_i32_23] : memref<8x128xf32, #tpu.memory_space<vmem>> -> memref<1x128xf32, #tpu.memory_space<vmem>>
    %61 = tpu.memref_squeeze %60 : memref<1x128xf32, #tpu.memory_space<vmem>> -> memref<128xf32, #tpu.memory_space<vmem>>
    %62 = tpu.memref_slice %arg10[%c7_i32_21] : memref<8x!tpu.dma_semaphore, #tpu.memory_space<semaphore_mem>> -> memref<1x!tpu.dma_semaphore, #tpu.memory_space<semaphore_mem>>
    %63 = tpu.memref_squeeze %62 : memref<1x!tpu.dma_semaphore, #tpu.memory_space<semaphore_mem>> -> memref<!tpu.dma_semaphore, #tpu.memory_space<semaphore_mem>>
    tpu.enqueue_dma source(%59 : memref<128xf32, #tpu.memory_space<any>>) target(%61 : memref<128xf32, #tpu.memory_space<vmem>>) target_semaphore(%63 : memref<!tpu.dma_semaphore, #tpu.memory_space<semaphore_mem>>)
    %c0_24 = arith.constant 0 : index
    %c0_25 = arith.constant 0 : index
    %c0_26 = arith.constant 0 : index
    %c0_27 = arith.constant 0 : index
    %64 = vector.load %arg3[%c0_24, %c0_25, %c0_26, %c0_27] : memref<1x2x4x256xf32, #tpu.memory_space<vmem>>, vector<1x2x4x256xf32>
    %65 = vector.shape_cast %64 : vector<1x2x4x256xf32> to vector<2x4x256xf32>
    %cst = arith.constant dense<0.000000e+00> : vector<2x4xf32>
    %66 = vector.multi_reduction <add>, %65, %cst [2] : vector<2x4x256xf32> to vector<2x4xf32>
    %cst_28 = arith.constant 2.560000e+02 : f32
    %67 = vector.broadcast %cst_28 : f32 to vector<2x4xf32>
    %68 = arith.divf %66, %67 : vector<2x4xf32>
    %69 = arith.truncf %68 : vector<2x4xf32> to vector<2x4xbf16>
    %c0_29 = arith.constant 0 : index
    %c0_30 = arith.constant 0 : index
    %70 = vector.load %arg4[%c0_29, %c0_30] : memref<4x128xbf16, #tpu.memory_space<vmem>>, vector<4x128xbf16>
    %cst_31 = arith.constant dense<0.000000e+00> : vector<2x128xf32>
    %71 = tpu.matmul %69, %70, %cst_31 {dimension_numbers = #tpu.dot_dimension_numbers<[1], [0], [0], [1], [0, 0, 1, 1], [], []>} : vector<2x4xbf16>, vector<4x128xbf16>, vector<2x128xf32> -> vector<2x128xf32>
    %c0_32 = arith.constant 0 : index
    %c0_33 = arith.constant 0 : index
    %72 = vector.load %arg5[%c0_32, %c0_33] : memref<1x128xf32, #tpu.memory_space<vmem>>, vector<1x128xf32>
    %73 = vector.broadcast %72 : vector<1x128xf32> to vector<2x128xf32>
    %74 = arith.addf %71, %73 : vector<2x128xf32>
    %75 = arith.truncf %74 : vector<2x128xf32> to vector<2x128xbf16>
    %c0_34 = arith.constant 0 : index
    %c0_35 = arith.constant 0 : index
    %76 = vector.load %arg6[%c0_34, %c0_35] : memref<128x128xbf16, #tpu.memory_space<vmem>>, vector<128x128xbf16>
    %cst_36 = arith.constant dense<0.000000e+00> : vector<2x128xf32>
    %77 = tpu.matmul %75, %76, %cst_36 {dimension_numbers = #tpu.dot_dimension_numbers<[1], [0], [0], [1], [0, 0, 1, 1], [], []>} : vector<2x128xbf16>, vector<128x128xbf16>, vector<2x128xf32> -> vector<2x128xf32>
    %c0_37 = arith.constant 0 : index
    %c0_38 = arith.constant 0 : index
    %78 = vector.load %arg7[%c0_37, %c0_38] : memref<1x128xf32, #tpu.memory_space<vmem>>, vector<1x128xf32>
    %79 = vector.broadcast %78 : vector<1x128xf32> to vector<2x128xf32>
    %80 = arith.addf %77, %79 : vector<2x128xf32>
    %cst_39 = arith.constant 0.000000e+00 : f32
    %81 = vector.broadcast %cst_39 : f32 to vector<2x128xf32>
    %82 = arith.maximumf %80, %81 : vector<2x128xf32>
    %83 = arith.index_cast %arg0 : i32 to index
    %c0_40 = arith.constant 0 : index
    %84 = memref.load %arg1[%83, %c0_40] : memref<2x8xi32, #tpu.memory_space<smem>>
    %c0_i32_41 = arith.constant 0 : i32
    %c0_i32_42 = arith.constant 0 : i32
    %c0_i32_43 = arith.constant 0 : i32
    %85 = tpu.memref_slice %arg2[%84, %c0_i32_43] : memref<128x128xf32, #tpu.memory_space<any>> -> memref<1x128xf32, #tpu.memory_space<any>>
    %86 = tpu.memref_squeeze %85 : memref<1x128xf32, #tpu.memory_space<any>> -> memref<128xf32, #tpu.memory_space<any>>
    %c0_i32_44 = arith.constant 0 : i32
    %87 = tpu.memref_slice %arg9[%c0_i32_41, %c0_i32_44] : memref<8x128xf32, #tpu.memory_space<vmem>> -> memref<1x128xf32, #tpu.memory_space<vmem>>
    %88 = tpu.memref_squeeze %87 : memref<1x128xf32, #tpu.memory_space<vmem>> -> memref<128xf32, #tpu.memory_space<vmem>>
    %89 = tpu.memref_slice %arg10[%c0_i32_42] : memref<8x!tpu.dma_semaphore, #tpu.memory_space<semaphore_mem>> -> memref<1x!tpu.dma_semaphore, #tpu.memory_space<semaphore_mem>>
    %90 = tpu.memref_squeeze %89 : memref<1x!tpu.dma_semaphore, #tpu.memory_space<semaphore_mem>> -> memref<!tpu.dma_semaphore, #tpu.memory_space<semaphore_mem>>
    tpu.wait_dma2 semaphore(%90 : memref<!tpu.dma_semaphore, #tpu.memory_space<semaphore_mem>>) src(%86 : memref<128xf32, #tpu.memory_space<any>>) dst(%88 : memref<128xf32, #tpu.memory_space<vmem>>)
    %91 = arith.index_cast %arg0 : i32 to index
    %c1_45 = arith.constant 1 : index
    %92 = memref.load %arg1[%91, %c1_45] : memref<2x8xi32, #tpu.memory_space<smem>>
    %c1_i32_46 = arith.constant 1 : i32
    %c1_i32_47 = arith.constant 1 : i32
    %c0_i32_48 = arith.constant 0 : i32
    %93 = tpu.memref_slice %arg2[%92, %c0_i32_48] : memref<128x128xf32, #tpu.memory_space<any>> -> memref<1x128xf32, #tpu.memory_space<any>>
    %94 = tpu.memref_squeeze %93 : memref<1x128xf32, #tpu.memory_space<any>> -> memref<128xf32, #tpu.memory_space<any>>
    %c0_i32_49 = arith.constant 0 : i32
    %95 = tpu.memref_slice %arg9[%c1_i32_46, %c0_i32_49] : memref<8x128xf32, #tpu.memory_space<vmem>> -> memref<1x128xf32, #tpu.memory_space<vmem>>
    %96 = tpu.memref_squeeze %95 : memref<1x128xf32, #tpu.memory_space<vmem>> -> memref<128xf32, #tpu.memory_space<vmem>>
    %97 = tpu.memref_slice %arg10[%c1_i32_47] : memref<8x!tpu.dma_semaphore, #tpu.memory_space<semaphore_mem>> -> memref<1x!tpu.dma_semaphore, #tpu.memory_space<semaphore_mem>>
    %98 = tpu.memref_squeeze %97 : memref<1x!tpu.dma_semaphore, #tpu.memory_space<semaphore_mem>> -> memref<!tpu.dma_semaphore, #tpu.memory_space<semaphore_mem>>
    tpu.wait_dma2 semaphore(%98 : memref<!tpu.dma_semaphore, #tpu.memory_space<semaphore_mem>>) src(%94 : memref<128xf32, #tpu.memory_space<any>>) dst(%96 : memref<128xf32, #tpu.memory_space<vmem>>)
    %99 = arith.index_cast %arg0 : i32 to index
    %c2_50 = arith.constant 2 : index
    %100 = memref.load %arg1[%99, %c2_50] : memref<2x8xi32, #tpu.memory_space<smem>>
    %c2_i32_51 = arith.constant 2 : i32
    %c2_i32_52 = arith.constant 2 : i32
    %c0_i32_53 = arith.constant 0 : i32
    %101 = tpu.memref_slice %arg2[%100, %c0_i32_53] : memref<128x128xf32, #tpu.memory_space<any>> -> memref<1x128xf32, #tpu.memory_space<any>>
    %102 = tpu.memref_squeeze %101 : memref<1x128xf32, #tpu.memory_space<any>> -> memref<128xf32, #tpu.memory_space<any>>
    %c0_i32_54 = arith.constant 0 : i32
    %103 = tpu.memref_slice %arg9[%c2_i32_51, %c0_i32_54] : memref<8x128xf32, #tpu.memory_space<vmem>> -> memref<1x128xf32, #tpu.memory_space<vmem>>
    %104 = tpu.memref_squeeze %103 : memref<1x128xf32, #tpu.memory_space<vmem>> -> memref<128xf32, #tpu.memory_space<vmem>>
    %105 = tpu.memref_slice %arg10[%c2_i32_52] : memref<8x!tpu.dma_semaphore, #tpu.memory_space<semaphore_mem>> -> memref<1x!tpu.dma_semaphore, #tpu.memory_space<semaphore_mem>>
    %106 = tpu.memref_squeeze %105 : memref<1x!tpu.dma_semaphore, #tpu.memory_space<semaphore_mem>> -> memref<!tpu.dma_semaphore, #tpu.memory_space<semaphore_mem>>
    tpu.wait_dma2 semaphore(%106 : memref<!tpu.dma_semaphore, #tpu.memory_space<semaphore_mem>>) src(%102 : memref<128xf32, #tpu.memory_space<any>>) dst(%104 : memref<128xf32, #tpu.memory_space<vmem>>)
    %107 = arith.index_cast %arg0 : i32 to index
    %c3_55 = arith.constant 3 : index
    %108 = memref.load %arg1[%107, %c3_55] : memref<2x8xi32, #tpu.memory_space<smem>>
    %c3_i32_56 = arith.constant 3 : i32
    %c3_i32_57 = arith.constant 3 : i32
    %c0_i32_58 = arith.constant 0 : i32
    %109 = tpu.memref_slice %arg2[%108, %c0_i32_58] : memref<128x128xf32, #tpu.memory_space<any>> -> memref<1x128xf32, #tpu.memory_space<any>>
    %110 = tpu.memref_squeeze %109 : memref<1x128xf32, #tpu.memory_space<any>> -> memref<128xf32, #tpu.memory_space<any>>
    %c0_i32_59 = arith.constant 0 : i32
    %111 = tpu.memref_slice %arg9[%c3_i32_56, %c0_i32_59] : memref<8x128xf32, #tpu.memory_space<vmem>> -> memref<1x128xf32, #tpu.memory_space<vmem>>
    %112 = tpu.memref_squeeze %111 : memref<1x128xf32, #tpu.memory_space<vmem>> -> memref<128xf32, #tpu.memory_space<vmem>>
    %113 = tpu.memref_slice %arg10[%c3_i32_57] : memref<8x!tpu.dma_semaphore, #tpu.memory_space<semaphore_mem>> -> memref<1x!tpu.dma_semaphore, #tpu.memory_space<semaphore_mem>>
    %114 = tpu.memref_squeeze %113 : memref<1x!tpu.dma_semaphore, #tpu.memory_space<semaphore_mem>> -> memref<!tpu.dma_semaphore, #tpu.memory_space<semaphore_mem>>
    tpu.wait_dma2 semaphore(%114 : memref<!tpu.dma_semaphore, #tpu.memory_space<semaphore_mem>>) src(%110 : memref<128xf32, #tpu.memory_space<any>>) dst(%112 : memref<128xf32, #tpu.memory_space<vmem>>)
    %115 = arith.index_cast %arg0 : i32 to index
    %c4_60 = arith.constant 4 : index
    %116 = memref.load %arg1[%115, %c4_60] : memref<2x8xi32, #tpu.memory_space<smem>>
    %c4_i32_61 = arith.constant 4 : i32
    %c4_i32_62 = arith.constant 4 : i32
    %c0_i32_63 = arith.constant 0 : i32
    %117 = tpu.memref_slice %arg2[%116, %c0_i32_63] : memref<128x128xf32, #tpu.memory_space<any>> -> memref<1x128xf32, #tpu.memory_space<any>>
    %118 = tpu.memref_squeeze %117 : memref<1x128xf32, #tpu.memory_space<any>> -> memref<128xf32, #tpu.memory_space<any>>
    %c0_i32_64 = arith.constant 0 : i32
    %119 = tpu.memref_slice %arg9[%c4_i32_61, %c0_i32_64] : memref<8x128xf32, #tpu.memory_space<vmem>> -> memref<1x128xf32, #tpu.memory_space<vmem>>
    %120 = tpu.memref_squeeze %119 : memref<1x128xf32, #tpu.memory_space<vmem>> -> memref<128xf32, #tpu.memory_space<vmem>>
    %121 = tpu.memref_slice %arg10[%c4_i32_62] : memref<8x!tpu.dma_semaphore, #tpu.memory_space<semaphore_mem>> -> memref<1x!tpu.dma_semaphore, #tpu.memory_space<semaphore_mem>>
    %122 = tpu.memref_squeeze %121 : memref<1x!tpu.dma_semaphore, #tpu.memory_space<semaphore_mem>> -> memref<!tpu.dma_semaphore, #tpu.memory_space<semaphore_mem>>
    tpu.wait_dma2 semaphore(%122 : memref<!tpu.dma_semaphore, #tpu.memory_space<semaphore_mem>>) src(%118 : memref<128xf32, #tpu.memory_space<any>>) dst(%120 : memref<128xf32, #tpu.memory_space<vmem>>)
    %123 = arith.index_cast %arg0 : i32 to index
    %c5_65 = arith.constant 5 : index
    %124 = memref.load %arg1[%123, %c5_65] : memref<2x8xi32, #tpu.memory_space<smem>>
    %c5_i32_66 = arith.constant 5 : i32
    %c5_i32_67 = arith.constant 5 : i32
    %c0_i32_68 = arith.constant 0 : i32
    %125 = tpu.memref_slice %arg2[%124, %c0_i32_68] : memref<128x128xf32, #tpu.memory_space<any>> -> memref<1x128xf32, #tpu.memory_space<any>>
    %126 = tpu.memref_squeeze %125 : memref<1x128xf32, #tpu.memory_space<any>> -> memref<128xf32, #tpu.memory_space<any>>
    %c0_i32_69 = arith.constant 0 : i32
    %127 = tpu.memref_slice %arg9[%c5_i32_66, %c0_i32_69] : memref<8x128xf32, #tpu.memory_space<vmem>> -> memref<1x128xf32, #tpu.memory_space<vmem>>
    %128 = tpu.memref_squeeze %127 : memref<1x128xf32, #tpu.memory_space<vmem>> -> memref<128xf32, #tpu.memory_space<vmem>>
    %129 = tpu.memref_slice %arg10[%c5_i32_67] : memref<8x!tpu.dma_semaphore, #tpu.memory_space<semaphore_mem>> -> memref<1x!tpu.dma_semaphore, #tpu.memory_space<semaphore_mem>>
    %130 = tpu.memref_squeeze %129 : memref<1x!tpu.dma_semaphore, #tpu.memory_space<semaphore_mem>> -> memref<!tpu.dma_semaphore, #tpu.memory_space<semaphore_mem>>
    tpu.wait_dma2 semaphore(%130 : memref<!tpu.dma_semaphore, #tpu.memory_space<semaphore_mem>>) src(%126 : memref<128xf32, #tpu.memory_space<any>>) dst(%128 : memref<128xf32, #tpu.memory_space<vmem>>)
    %131 = arith.index_cast %arg0 : i32 to index
    %c6_70 = arith.constant 6 : index
    %132 = memref.load %arg1[%131, %c6_70] : memref<2x8xi32, #tpu.memory_space<smem>>
    %c6_i32_71 = arith.constant 6 : i32
    %c6_i32_72 = arith.constant 6 : i32
    %c0_i32_73 = arith.constant 0 : i32
    %133 = tpu.memref_slice %arg2[%132, %c0_i32_73] : memref<128x128xf32, #tpu.memory_space<any>> -> memref<1x128xf32, #tpu.memory_space<any>>
    %134 = tpu.memref_squeeze %133 : memref<1x128xf32, #tpu.memory_space<any>> -> memref<128xf32, #tpu.memory_space<any>>
    %c0_i32_74 = arith.constant 0 : i32
    %135 = tpu.memref_slice %arg9[%c6_i32_71, %c0_i32_74] : memref<8x128xf32, #tpu.memory_space<vmem>> -> memref<1x128xf32, #tpu.memory_space<vmem>>
    %136 = tpu.memref_squeeze %135 : memref<1x128xf32, #tpu.memory_space<vmem>> -> memref<128xf32, #tpu.memory_space<vmem>>
    %137 = tpu.memref_slice %arg10[%c6_i32_72] : memref<8x!tpu.dma_semaphore, #tpu.memory_space<semaphore_mem>> -> memref<1x!tpu.dma_semaphore, #tpu.memory_space<semaphore_mem>>
    %138 = tpu.memref_squeeze %137 : memref<1x!tpu.dma_semaphore, #tpu.memory_space<semaphore_mem>> -> memref<!tpu.dma_semaphore, #tpu.memory_space<semaphore_mem>>
    tpu.wait_dma2 semaphore(%138 : memref<!tpu.dma_semaphore, #tpu.memory_space<semaphore_mem>>) src(%134 : memref<128xf32, #tpu.memory_space<any>>) dst(%136 : memref<128xf32, #tpu.memory_space<vmem>>)
    %139 = arith.index_cast %arg0 : i32 to index
    %c7_75 = arith.constant 7 : index
    %140 = memref.load %arg1[%139, %c7_75] : memref<2x8xi32, #tpu.memory_space<smem>>
    %c7_i32_76 = arith.constant 7 : i32
    %c7_i32_77 = arith.constant 7 : i32
    %c0_i32_78 = arith.constant 0 : i32
    %141 = tpu.memref_slice %arg2[%140, %c0_i32_78] : memref<128x128xf32, #tpu.memory_space<any>> -> memref<1x128xf32, #tpu.memory_space<any>>
    %142 = tpu.memref_squeeze %141 : memref<1x128xf32, #tpu.memory_space<any>> -> memref<128xf32, #tpu.memory_space<any>>
    %c0_i32_79 = arith.constant 0 : i32
    %143 = tpu.memref_slice %arg9[%c7_i32_76, %c0_i32_79] : memref<8x128xf32, #tpu.memory_space<vmem>> -> memref<1x128xf32, #tpu.memory_space<vmem>>
    %144 = tpu.memref_squeeze %143 : memref<1x128xf32, #tpu.memory_space<vmem>> -> memref<128xf32, #tpu.memory_space<vmem>>
    %145 = tpu.memref_slice %arg10[%c7_i32_77] : memref<8x!tpu.dma_semaphore, #tpu.memory_space<semaphore_mem>> -> memref<1x!tpu.dma_semaphore, #tpu.memory_space<semaphore_mem>>
    %146 = tpu.memref_squeeze %145 : memref<1x!tpu.dma_semaphore, #tpu.memory_space<semaphore_mem>> -> memref<!tpu.dma_semaphore, #tpu.memory_space<semaphore_mem>>
    tpu.wait_dma2 semaphore(%146 : memref<!tpu.dma_semaphore, #tpu.memory_space<semaphore_mem>>) src(%142 : memref<128xf32, #tpu.memory_space<any>>) dst(%144 : memref<128xf32, #tpu.memory_space<vmem>>)
    %c0_80 = arith.constant 0 : index
    %c0_81 = arith.constant 0 : index
    %147 = vector.load %arg9[%c0_80, %c0_81] : memref<8x128xf32, #tpu.memory_space<vmem>>, vector<8x128xf32>
    %c0_82 = arith.constant 0 : index
    %c0_83 = arith.constant 0 : index
    %c0_84 = arith.constant 0 : index
    %148 = vector.load %arg8[%c0_82, %c0_83, %c0_84] : memref<1x10x128xf32, #tpu.memory_space<vmem>>, vector<1x8x128xf32>
    %149 = vector.shape_cast %148 : vector<1x8x128xf32> to vector<8x128xf32>
    %150 = vector.shape_cast %147 : vector<8x128xf32> to vector<1x8x128xf32>
    tpu.vector_store %arg8[%c0_82, %c0_83, %c0_84], %150 {strides = array<i32>} : memref<1x10x128xf32, #tpu.memory_space<vmem>>, vector<1x8x128xf32>,
    %c0_85 = arith.constant 0 : index
    %c8 = arith.constant 8 : index
    %c0_86 = arith.constant 0 : index
    %151 = vector.load %arg8[%c0_85, %c8, %c0_86] : memref<1x10x128xf32, #tpu.memory_space<vmem>>, vector<1x2x128xf32>
    %152 = vector.shape_cast %151 : vector<1x2x128xf32> to vector<2x128xf32>
    %153 = vector.shape_cast %82 : vector<2x128xf32> to vector<1x2x128xf32>
    tpu.vector_store %arg8[%c0_85, %c8, %c0_86], %153 {strides = array<i32>} : memref<1x10x128xf32, #tpu.memory_space<vmem>>, vector<1x2x128xf32>,
    return
  }
  func.func @transform_1(%arg0: i32, %arg1: memref<2x8xi32, #tpu.memory_space<smem>>) -> (i32, i32, i32, i32) {
    %c0_i32 = arith.constant 0 : i32
    %c0_i32_0 = arith.constant 0 : i32
    %c0_i32_1 = arith.constant 0 : i32
    %c0_i32_2 = arith.constant 0 : i32
    return %arg0, %c0_i32, %c0_i32_0, %c0_i32_1 : i32, i32, i32, i32
  }
  func.func @transform_2(%arg0: i32, %arg1: memref<2x8xi32, #tpu.memory_space<smem>>) -> (i32, i32) {
    %c0_i32 = arith.constant 0 : i32
    %c0_i32_0 = arith.constant 0 : i32
    %c0_i32_1 = arith.constant 0 : i32
    return %c0_i32, %c0_i32_0 : i32, i32
  }
  func.func @transform_3(%arg0: i32, %arg1: memref<2x8xi32, #tpu.memory_space<smem>>) -> (i32, i32) {
    %c0_i32 = arith.constant 0 : i32
    %c0_i32_0 = arith.constant 0 : i32
    %c0_i32_1 = arith.constant 0 : i32
    return %c0_i32, %c0_i32_0 : i32, i32
  }
  func.func @transform_4(%arg0: i32, %arg1: memref<2x8xi32, #tpu.memory_space<smem>>) -> (i32, i32) {
    %c0_i32 = arith.constant 0 : i32
    %c0_i32_0 = arith.constant 0 : i32
    %c0_i32_1 = arith.constant 0 : i32
    return %c0_i32, %c0_i32_0 : i32, i32
  }
  func.func @transform_5(%arg0: i32, %arg1: memref<2x8xi32, #tpu.memory_space<smem>>) -> (i32, i32) {
    %c0_i32 = arith.constant 0 : i32
    %c0_i32_0 = arith.constant 0 : i32
    %c0_i32_1 = arith.constant 0 : i32
    return %c0_i32, %c0_i32_0 : i32, i32
  }
  func.func @transform_6(%arg0: i32, %arg1: memref<2x8xi32, #tpu.memory_space<smem>>) -> (i32, i32, i32) {
    %c0_i32 = arith.constant 0 : i32
    %c0_i32_0 = arith.constant 0 : i32
    %c0_i32_1 = arith.constant 0 : i32
    return %arg0, %c0_i32, %c0_i32_0 : i32, i32, i32
  }
}

</mosaic_0001>

<bundles_post_ra>
// kernel: tpu_custom_call.1
= control target key start
LH: loop header
LB: loop body
LE: loop exit
PB: predicated region body
PF: predicated region fallthrough
CT: control target
= control target key end

     0   :  { %s1197_s27 = smov [#allocation5]   ;;  %s1475_s0 = inlined_call_operand.hbm [shape: s32[2,8], index: 0, kind: input, shape index: {}]   ;;  %s1476_s1 = inlined_call_operand.hbm [shape: f32[128,128], index: 1, kind: input, shape index: {}]   ;;  %s1477_s2 = inlined_call_operand.hbm [shape: f32[2,2,4,256], index: 2, kind: input, shape index: {}]   ;;  %s1478_s3 = inlined_call_operand.vmem [shape: bf16[4,128], index: 3, kind: input, shape index: {}]   ;;  %s1479_s4 = inlined_call_operand.vmem [shape: f32[1,128], index: 4, kind: input, shape index: {}]   ;;  %s1480_s5 = inlined_call_operand.hbm [shape: bf16[128,128], index: 5, kind: input, shape index: {}]   ;;  %s1481_s6 = inlined_call_operand.vmem [shape: f32[1,128], index: 6, kind: input, shape index: {}]   ;;  %s1482_s7 = inlined_call_operand.vmem [shape: f32[2,10,128], index: 7, kind: output, shape index: {}]  }
   0x1   :  { %1483 = sst [smem:[#allocation39_spill]] %s1477_s2  ;;  %s13_s26 = sshll.u32 %s1475_s0, 4  ;;  %s14_s26 = int_to_ptr.hbm [resolvable:$true] %s13_s26 }
   0x2   :  { %16 = dma.hbm_to_smem %s14_s26, 32, %s1197_s27, [#allocation4] }
   0x3   :  { %1155 = dma.done.wait [#allocation4], 32 }
   0x4   :  { %1156 = vsyncadd [#allocation4], 4294967264 }
   0x5   :  { %19 = sfence }
   0x6   :  { %20 = vsyncpa [#allocation7], 0 }
   0x7   :  { %22 = vsyncpa [#allocation7 + $0x1], 0 }
   0x8   :  { %23 = vsyncpa [#allocation9], 0  ;;  %s1255_s28 = smov 0   ;;  %s1257_s29 = smov 0  }
   0x9   :  { %s1259_s30 = smov 0   ;;  %s1261_s8 = smov 0  }
   0xa LB: > { %s1274_s0 = sadd.s32 4294967295, %s1195_s8   ;;  %p49_p0 = scmp.ne.s32.totalorder %s1187_s29, %s1183_s28  ;;  %s1195_s8 = sphi %s1261_s8, %s1492_s8   ;;  %s1191_s30 = sphi %s1259_s30, %s1491_s30   ;;  %s1187_s29 = sphi %s1257_s29, %s1490_s29   ;;  %s1183_s28 = sphi %s1255_s28, %s1489_s28  }
   0xb   : > { %p50_p1 = scmp.eq.s32.totalorder %s1274_s0, 0  ;;  %p742_p2 = scmp.ge.s32.totalorder %s1195_s8, 1 }
   0xc   : > { %p170_p3 = scmp.lt.s32.totalorder %s1195_s8, 3  ;;  %s187_s12 = sshll.u32 %s1480_s5, 4  ;;  %s188_s12 = int_to_ptr.hbm [resolvable:$true] %s187_s12 }
   0xd   : > { %p1282_p4 = por %p50_p1, %p49_p0  ;;  %s1198_s14 = smov [#allocation8]  }
   0xe   : > { %p1289_p5 = pnand %p742_p2, %p170_p3  ;;  %s189_s15 = sshll.u32 %s1198_s14, 4  ;;  %s190_s15 = int_to_ptr.vmem [resolvable:$true] %s189_s15 }
   0xf   : > { %s1298_s16 = sadd.s32 1, %s1195_s8   ;;  %s1199_s17 = smov 64  }
  0x10   : > { %p813_p6 = pneg %p1289_p5  ;;  %s1200_s18 = smov 4  }
  0x11   : > { %s33_s19 = ssub.s32 %s1195_s8, %s1298_s16  ;;  %s36_s20 = sadd.s32 1, %s1191_s30 }
  0x12   : > { %p814_p7 = pnand %p813_p6, %p50_p1  ;;  %p34_p8 = scmp.eq.s32.totalorder %s33_s19, 0 }
  0x13   : > { %p43_p9 = scmp.ne.s32.totalorder %s1191_s30, %s1187_s29  ;;  %p44_p10 = scmp.eq.s32.totalorder %s1195_s8, 0 }
  0x14   : > { %816 = dma.hbm_to_vmem [thread:$0]  (!%p814_p7), %s188_s12, 1024, %s190_s15, [#allocation9], %s1199_s17, %s1199_s17, %s1200_s18  }
  0x15   : > { %p822_p11 = scmp.lt.s32.totalorder %s1195_s8, 2  ;;  %p45_p12 = por %p44_p10, %p43_p9 }
  0x16   : > { %s1308_s21 = scalar_select %p34_p8, %s1191_s30, %s36_s20  }
  0x17   : > { %s206_s22 = sand.u32 1, %s1191_s30   ;;  %s797_s24 = sshll.u32 %s1195_s8, 4 }
  0x18   : > { %s745_s23 = sshll.u32 %s206_s22, 4  ;;  %s1486_s2 = sld [smem:[#allocation39_spill]] }
  0x19   : > { %s210_s28 = scalar_lea.vmem [#allocation6], %s745_s23  ;;  %p1315_p13 = pnand %p822_p11, %p45_p12 }
  0x1a   : > { %s218_s10 = sshll.u32 %s210_s28, 4  ;;  %s207_s14 = scalar_lea.sflag [#allocation7], %s206_s22  ;;  %s219_s10 = int_to_ptr.vmem [resolvable:$true] %s218_s10 }
  0x1b   : > { %p921_p2 = pneg %p1315_p13 }
  0x1e   : > { %s215_s27 = scalar_lea.hbm %s1486_s2, %s797_s24  ;;  %s924_s19 = scalar_lea.hbm %s1486_s2, 32 }
  0x1f   : > { %s216_s11 = sshll.u32 %s215_s27, 4  ;;  %s217_s11 = int_to_ptr.hbm [resolvable:$true] %s216_s11 }
  0x20   : > { %s917_s15 = sshra.s32 %s217_s11, 4  ;;  %s918_s15 = int_to_ptr.hbm [resolvable:$true] %s917_s15 }
  0x21   : > { %s919_s17 = scalar_lea.hbm %s918_s15, 16  ;;  %p925_p7 = scmp.lt.s32.totalorder %s918_s15, %s1486_s2 }
  0x22   : > { %p920_p0 = scmp.ne.s32.totalorder %s918_s15, %s919_s17  ;;  %p926_p8 = scmp.lt.s32.totalorder %s924_s19, %s919_s17 }
  0x24   : > { %p922_p3 = pnand %p921_p2, %p920_p0  ;;  %p927_p9 = por %p926_p8, %p925_p7 }
  0x26   : > { %p923_p6 = pneg %p922_p3 }
  0x28   : > { %p928_p10 = pnand %p927_p9, %p923_p6 }
  0x2a   : > { %931 = shalt.err (!%p928_p10)
}
  0x2b   : > { %s1201_s22 = smov 128   ;;  %s1202_s24 = smov 8  }
  0x2c   : > { %820 = dma.hbm_to_vmem [thread:$0]  (!%p1315_p13), %s217_s11, 256, %s219_s10, %s207_s14, %s1201_s22, %s1201_s22, %s1202_s24  }
  0x2d   : > { %230 = sbr.rel (%p1289_p5) target bundleno = 481 (0x1e1), region = 40  ;;  %s232_s25 = sand.u32 (!%p1289_p5), 1, %s1187_s29  }
  0x2e   : > { %s749_s26 = sshll.u32 (!%p1289_p5), %s232_s25, 4  ;;  %s233_s27 = scalar_lea.sflag (!%p1289_p5), [#allocation7], %s232_s25 }
  0x2f   : > { %s236_s28 = scalar_lea.vmem (!%p1289_p5), [#allocation6], %s749_s26 }
  0x32   : > { %1158 = dma.done.wait (%p1282_p4), %s233_s27, 256  }
  0x33   : > { %1160 = vsyncadd (%p1282_p4), %s233_s27, 4294967040 }
  0x34   : > { %1162 = dma.done.wait (%p50_p1), [#allocation9], 1024  }
  0x35   : > { %1164 = vsyncadd (%p50_p1), [#allocation9], 4294966272  ;;  %v417_v0 = vld [vmem:[%s236_s28] sm:$0xff]  ;;  %v418_v1 = vld [vmem:[%s236_s28 + $0x8] sm:$0xff]  ;;  %vm432_vm0 = vcmask 1043456   ;;  %v1203_v12 = vmov 256.0   ;;  %v463_v29 = vlaneseq }
  0x36   : > { %421 = vst [vmem:[#allocation1] ss:$2 sm:$0xff] %v417_v0  ;;  %873 = vrcp.f32 %v1203_v12  ;;  %v454_v14 = vld [vmem:[%s1478_s3] sm:$0x3]  ;;  %vm474_vm1 = vcmask 1041408   ;;  %v806_v18 = vld [vmem:[#allocation8 + $0x38] sm:$0xff] }
  0x37   : > { %425 = vst [vmem:[#allocation1 + $0x10] ss:$2 sm:$0xff] %v418_v1  ;;  %v476_v16 = vsel %vm474_vm1, %v454_v14, 0  ;;  %560 = vmatpush.bf16.msra.mxu1 %v806_v18  ;;  %v805_v19 = vld [vmem:[#allocation8 + $0x30] sm:$0xff]  ;;  %v804_v21 = vld [vmem:[#allocation8 + $0x28] sm:$0xff]  ;;  %v803_v23 = vld [vmem:[#allocation8 + $0x20] sm:$0xff] }
  0x38   : > { %485 = vmatpush.bf16.msra.mxu0 %v476_v16  ;;  %v802_v26 = vld [vmem:[#allocation8 + $0x18] sm:$0xff]  ;;  %v801_v28 = vld [vmem:[#allocation8 + $0x10] sm:$0xff]  ;;  %v800_v33 = vld [vmem:[#allocation8 + $0x8] sm:$0xff]  ;;  %v464_v34 = vand.u32 127, %v463_v29  ;;  %vm467_vm3 = vcmask 1041409   ;;  %vm470_vm4 = vcmask 31744  }
  0x39   : > { %v799_v42 = vld [vmem:[#allocation8] sm:$0xff]  ;;  %s1344_s10 = sshll.u32 %s1274_s0, 7  ;;  %v871_v43 = vld [vmem:[%s1479_s4] ss:$0 sm:$0xff] }
  0x3a   : > { %s276_s11 = sld [smem:[#allocation5 + %s1344_s10]]  ;;  %s291_s12 = sadd.s32 1, %s1344_s10 }
  0x3b   : > { %561 = vmatpush.bf16.msra.mxu1 %v805_v19  ;;  %s1348_s14 = sld [smem:[#allocation5 + %s291_s12]]  ;;  %s309_s15 = sadd.s32 2, %s1344_s10 }
  0x3c   : > { %v874_v13 = vpop.eup %873  ;;  %s1351_s17 = sld [smem:[#allocation5 + %s309_s15]]  ;;  %s327_s8 = sadd.s32 3, %s1344_s10 }
  0x3d   : > { %v422_v2 = vld.sshfl [vmem:[#allocation1] sm:$0xff pattern:$0x75316420]  ;;  %v423_v3 = vld.sshfl [vmem:[#allocation1 + $0x8] sm:$0xff pattern:$0x75316420]  ;;  %vm448_vm2 = vweird.f32 %v874_v13 }
  0x3e   : > { %v433_v4 = vsel %vm432_vm0, %v422_v2, 0.0  ;;  %v434_v5 = vsel %vm432_vm0, %v423_v3, 0.0  ;;  %v426_v7 = vld.sshfl [vmem:[#allocation1 + $0x10] sm:$0xff pattern:$0x75316420]  ;;  %v444_v15 = vmul.f32 256.0, %v874_v13 }
  0x3f   : > { %v435_v6 = vadd.f32 %v434_v5, %v433_v4  ;;  %v427_v8 = vld.sshfl [vmem:[#allocation1 + $0x18] sm:$0xff pattern:$0x75316420]  ;;  %v438_v9 = vsel %vm432_vm0, %v426_v7, 0.0  ;;  %562 = vmatpush.bf16.msra.mxu1 %v804_v21  ;;  %s1357_s20 = sld [smem:[#allocation5 + %s327_s8]]  ;;  %s345_s23 = sadd.s32 4, %s1344_s10 }
  0x40   : > { %v439_v10 = vsel %vm432_vm0, %v427_v8, 0.0  ;;  %v445_v17 = vsub.f32 1.0, %v444_v15  ;;  %s1360_s22 = sld [smem:[#allocation5 + %s345_s23]]  ;;  %s363_s24 = sadd.s32 5, %s1344_s10 }
  0x41   : > { %436 = vadd.xlane.f32.xlu0 %v435_v6  ;;  %v440_v11 = vadd.f32 %v439_v10, %v438_v9  ;;  %s1363_s25 = sld [smem:[#allocation5 + %s363_s24]]  ;;  %s277_s9 = scalar_lea.hbm %s1476_s1, %s276_s11 }
  0x42   : > { %v446_v20 = vmul.f32 %v874_v13, %v445_v17  ;;  %s285_s13 = sshll.u32 %s277_s9, 4  ;;  %s1204_s12 = smov [#allocation2]   ;;  %s286_s13 = int_to_ptr.hbm [resolvable:$true] %s285_s13 }
  0x43   : > { %563 = vmatpush.bf16.msra.mxu1 %v803_v23  ;;  %s287_s15 = sshll.u32 %s1204_s12, 4  ;;  %s947_s8 = sshra.s32 %s286_s13, 4  ;;  %s288_s15 = int_to_ptr.vmem [resolvable:$true] %s287_s15  ;;  %s948_s8 = int_to_ptr.hbm [resolvable:$true] %s947_s8 }
  0x44   : > { %v447_v22 = vadd.f32 %v874_v13, %v446_v20  ;;  %s949_s18 = scalar_lea.hbm %s948_s8, 1  ;;  %s1372_s24 = scalar_lea.hbm %s1476_s1, 128 }
  0x45   : > { %p950_p1 = scmp.ne.s32.totalorder %s948_s8, %s949_s18  ;;  %p952_p4 = scmp.lt.s32.totalorder %s948_s8, %s1476_s1 }
  0x46   : > { %v449_v24 = vsel %vm448_vm2, %v874_v13, %v447_v22  ;;  %p953_p5 = scmp.lt.s32.totalorder %s1372_s24, %s949_s18 }
  0x47   : > { %564 = vmatpush.bf16.msra.mxu1 %v802_v26 }
  0x48   : > { %p954_p11 = por %p953_p5, %p952_p4 }
  0x49   : > { %441 = vadd.xlane.f32.xlu0 %v440_v11 }
  0x4a   : > { %p955_p12 = pnand %p954_p11, %p950_p1 }
  0x4b   : > { %565 = vmatpush.bf16.msra.mxu1 %v801_v28 }
  0x4f   : > { %566 = vmatpush.bf16.msra.mxu1 %v800_v33 }
  0x53   : > { %567 = vmatpush.bf16.msra.mxu1 %v799_v42 }
  0xb4   : > { %v437_v25 = vpop.xlane.xlu0 %436 }
  0xb5   : > { %v450_v27 = vmul.f32 %v449_v24, %v437_v25 }
  0xb7   : > { %v452_v30 = vpack.c.bf16 %v450_v27, %v450_v27 }
  0xb9   : > { %v461_v35 = vunpack.c.l.b16 %v452_v30 }
  0xbb   : > { %v465_v38 = vperm.slane %v461_v35, %v464_v34 }
  0xbc   : > { %v442_v31 = vpop.xlane.xlu0 %441 }
  0xbd   : > { %v451_v32 = vmul.f32 %v449_v24, %v442_v31 }
  0xbf   : > { %v453_v36 = vpack.c.bf16 %v451_v32, %v451_v32 }
  0xc1   : > { %v462_v37 = vunpack.c.l.b16 %v453_v36 }
  0xc3   : > { %v466_v39 = vperm.slane %v462_v37, %v464_v34 }
  0xc5   : > { %v468_v40 = vsel %vm467_vm3, %v466_v39, %v465_v38 }
  0xc6   : > { %v469_v41 = vpack.c.b16 %v468_v40, %v468_v40 }
  0xc8   : > { %754 = vmatmul.msk.bf16.vlgmr.msra.gmra.mxu0 %vm470_vm4, %v469_v41 }
 0x145   : > { %v487_v44 = vpop.f32.mrf.mxu0 }
 0x146   : > { %v488_v45 = vadd.f32 %v871_v43, %v487_v44 }
 0x148   : > { %v491_v46 = vpack.c.bf16 %v488_v45, %v488_v45 }
 0x149   : > { %958 = shalt.err (!%p955_p12)  }
 0x14a   : > { %290 = dma.hbm_to_vmem [thread:$0]  %s286_s13, 16, %s288_s15, [#allocation3]  ;;  %568 = vmatmul.bf16.vlgmr.msra.gmra.mxu1 %v491_v46 }
 0x14b   : > { %s293_s28 = scalar_lea.hbm %s1476_s1, %s1348_s14  ;;  %p269_p13 = scmp.lt.s32.totalorder %s1274_s0, 1 }
 0x14c   : > { %s303_s9 = sshll.u32 %s293_s28, 4  ;;  %s1205_s2 = smov [#allocation2 + $0x1]   ;;  %s304_s9 = int_to_ptr.hbm [resolvable:$true] %s303_s9 }
 0x14d   : > { %s305_s26 = sshll.u32 %s1205_s2, 4  ;;  %s1494_s0 = smov (!%p269_p13, %s1274_s0), 1  ;;  %v489_v47 = vpop.f32.mrf.mxu0  ;;  %s306_s26 = int_to_ptr.vmem [resolvable:$true] %s305_s26 }
 0x14e   : > { %s311_s15 = scalar_lea.hbm %s1476_s1, %s1351_s17  ;;  %s798_s8 = sshll.u32 %s1494_s0, 4 }
 0x14f   : > { %s1388_s18 = sshll.u32 %s311_s15, 4  ;;  %s1393_s14 = scalar_lea.vmem %s1482_s7, %s798_s8  ;;  %s322_s18 = int_to_ptr.hbm [resolvable:$true] %s1388_s18 }
 0x150   : > { %s971_s11 = sshra.s32 %s304_s9, 4  ;;  %s972_s11 = int_to_ptr.hbm [resolvable:$true] %s971_s11 }
 0x151   : > { %s973_s27 = scalar_lea.hbm %s972_s11, 1  ;;  %p976_p2 = scmp.lt.s32.totalorder %s972_s11, %s1476_s1 }
 0x152   : > { %p974_p0 = scmp.ne.s32.totalorder %s972_s11, %s973_s27  ;;  %p977_p3 = scmp.lt.s32.totalorder %s1372_s24, %s973_s27 }
 0x154   : > { %p978_p6 = por %p977_p3, %p976_p2 }
 0x156   : > { %p979_p7 = pnand %p978_p6, %p974_p0 }
 0x158   : > { %982 = shalt.err (!%p979_p7)  }
 0x159   : > { %308 = dma.hbm_to_vmem [thread:$0]  %s304_s9, 16, %s306_s26, [#allocation3 + $0x1] }
 0x15a   : > { %s329_s12 = scalar_lea.hbm %s1476_s1, %s1357_s20  ;;  %s1206_s13 = smov [#allocation2 + $0x2]  }
 0x15b   : > { %s323_s15 = sshll.u32 %s1206_s13, 4  ;;  %s1404_s8 = sshll.u32 %s329_s12, 4  ;;  %s324_s15 = int_to_ptr.vmem [resolvable:$true] %s323_s15  ;;  %s340_s8 = int_to_ptr.hbm [resolvable:$true] %s1404_s8 }
 0x15c   : > { %s995_s19 = sshra.s32 %s322_s18, 4  ;;  %s996_s19 = int_to_ptr.hbm [resolvable:$true] %s995_s19 }
 0x15d   : > { %s997_s23 = scalar_lea.hbm %s996_s19, 1  ;;  %p1000_p9 = scmp.lt.s32.totalorder %s996_s19, %s1476_s1 }
 0x15e   : > { %p998_p8 = scmp.ne.s32.totalorder %s996_s19, %s997_s23  ;;  %p1001_p10 = scmp.lt.s32.totalorder %s1372_s24, %s997_s23 }
 0x160   : > { %p1002_p1 = por %p1001_p10, %p1000_p9 }
 0x162   : > { %p1003_p4 = pnand %p1002_p1, %p998_p8 }
 0x164   : > { %1006 = shalt.err (!%p1003_p4)  }
 0x165   : > { %326 = dma.hbm_to_vmem [thread:$0]  %s322_s18, 16, %s324_s15, [#allocation3 + $0x2] }
 0x166   : > { %s347_s26 = scalar_lea.hbm %s1476_s1, %s1360_s22  ;;  %s1207_s28 = smov [#allocation2 + $0x3]  }
 0x167   : > { %s341_s2 = sshll.u32 %s1207_s28, 4  ;;  %s1415_s0 = sshll.u32 %s347_s26, 4  ;;  %s342_s2 = int_to_ptr.vmem [resolvable:$true] %s341_s2  ;;  %s358_s0 = int_to_ptr.hbm [resolvable:$true] %s1415_s0 }
 0x168   : > { %s1019_s17 = sshra.s32 %s340_s8, 4  ;;  %s1020_s17 = int_to_ptr.hbm [resolvable:$true] %s1019_s17 }
 0x169   : > { %s1021_s12 = scalar_lea.hbm %s1020_s17, 1  ;;  %p1024_p11 = scmp.lt.s32.totalorder %s1020_s17, %s1476_s1 }
 0x16a   : > { %p1022_p5 = scmp.ne.s32.totalorder %s1020_s17, %s1021_s12  ;;  %p1025_p12 = scmp.lt.s32.totalorder %s1372_s24, %s1021_s12 }
 0x16c   : > { %p1026_p13 = por %p1025_p12, %p1024_p11 }
 0x16e   : > { %p1027_p0 = pnand %p1026_p13, %p1022_p5 }
 0x170   : > { %1030 = shalt.err (!%p1027_p0)  }
 0x171   : > { %344 = dma.hbm_to_vmem [thread:$0]  %s340_s8, 16, %s342_s2, [#allocation3 + $0x3] }
 0x172   : > { %s365_s15 = scalar_lea.hbm %s1476_s1, %s1363_s25  ;;  %s1208_s23 = smov [#allocation2 + $0x4]  }
 0x173   : > { %s359_s11 = sshll.u32 %s1208_s23, 4  ;;  %s1426_s27 = sshll.u32 %s365_s15, 4  ;;  %s360_s11 = int_to_ptr.vmem [resolvable:$true] %s359_s11  ;;  %s376_s27 = int_to_ptr.hbm [resolvable:$true] %s1426_s27 }
 0x174   : > { %s1043_s20 = sshra.s32 %s358_s0, 4  ;;  %s1044_s20 = int_to_ptr.hbm [resolvable:$true] %s1043_s20 }
 0x175   : > { %s1045_s9 = scalar_lea.hbm %s1044_s20, 1  ;;  %p1048_p3 = scmp.lt.s32.totalorder %s1044_s20, %s1476_s1 }
 0x176   : > { %p1046_p2 = scmp.ne.s32.totalorder %s1044_s20, %s1045_s9  ;;  %p1049_p6 = scmp.lt.s32.totalorder %s1372_s24, %s1045_s9 }
 0x178   : > { %p1050_p7 = por %p1049_p6, %p1048_p3 }
 0x17a   : > { %p1051_p8 = pnand %p1050_p7, %p1046_p2 }
 0x17c   : > { %1054 = shalt.err (!%p1051_p8)  }
 0x17d   : > { %362 = dma.hbm_to_vmem [thread:$0]  %s358_s0, 16, %s360_s11, [#allocation3 + $0x4] }
 0x17e   : > { %s1488_s25 = sadd.s32 6, %s1344_s10  ;;  %s1209_s2 = smov [#allocation2 + $0x5]  }
 0x17f   : > { %s382_s8 = sld [smem:[#allocation5 + %s1488_s25]]  ;;  %s377_s17 = sshll.u32 %s1209_s2, 4  ;;  %s378_s17 = int_to_ptr.vmem [resolvable:$true] %s377_s17 }
 0x180   : > { %s1210_s12 = smov [#allocation2 + $0x6]   ;;  %s1067_s19 = sshra.s32 %s376_s27, 4  ;;  %s1068_s19 = int_to_ptr.hbm [resolvable:$true] %s1067_s19 }
 0x181   : > { %s1435_s13 = sshll.u32 %s1210_s12, 4  ;;  %s1069_s22 = scalar_lea.hbm %s1068_s19, 1  ;;  %s396_s13 = int_to_ptr.vmem [resolvable:$true] %s1435_s13 }
 0x182   : > { %p1070_p9 = scmp.ne.s32.totalorder %s1068_s19, %s1069_s22  ;;  %p1072_p10 = scmp.lt.s32.totalorder %s1068_s19, %s1476_s1 }
 0x183   : > { %p1073_p1 = scmp.lt.s32.totalorder %s1372_s24, %s1069_s22 }
 0x185   : > { %p1074_p4 = por %p1073_p1, %p1072_p10 }
 0x187   : > { %p1075_p5 = pnand %p1074_p4, %p1070_p9 }
 0x189   : > { %1078 = shalt.err (!%p1075_p5)  }
 0x18a   : > { %380 = dma.hbm_to_vmem [thread:$0]  %s376_s27, 16, %s378_s17, [#allocation3 + $0x5] }
 0x18b   : > { %s399_s0 = sadd.s32 7, %s1344_s10  ;;  %s383_s9 = scalar_lea.hbm %s1476_s1, %s382_s8 }
 0x18c   : > { %s400_s23 = sld [smem:[#allocation5 + %s399_s0]]  ;;  %s393_s26 = sshll.u32 %s383_s9, 4  ;;  %s394_s26 = int_to_ptr.hbm [resolvable:$true] %s393_s26 }
 0x18d   : > { %s1211_s28 = smov [#allocation2 + $0x7]   ;;  %s1091_s2 = sshra.s32 %s394_s26, 4  ;;  %s1092_s2 = int_to_ptr.hbm [resolvable:$true] %s1091_s2 }
 0x18e   : > { %s413_s25 = sshll.u32 %s1211_s28, 4  ;;  %s1093_s12 = scalar_lea.hbm %s1092_s2, 1  ;;  %s414_s25 = int_to_ptr.vmem [resolvable:$true] %s413_s25 }
 0x18f   : > { %p1094_p11 = scmp.ne.s32.totalorder %s1092_s2, %s1093_s12  ;;  %p1096_p12 = scmp.lt.s32.totalorder %s1092_s2, %s1476_s1 }
 0x190   : > { %p1097_p13 = scmp.lt.s32.totalorder %s1372_s24, %s1093_s12 }
 0x192   : > { %p1098_p0 = por %p1097_p13, %p1096_p12 }
 0x194   : > { %p1099_p2 = pnand %p1098_p0, %p1094_p11 }
 0x196   : > { %1102 = shalt.err (!%p1099_p2)  }
 0x197   : > { %398 = dma.hbm_to_vmem [thread:$0]  %s394_s26, 16, %s396_s13, [#allocation3 + $0x6] }
 0x198   : > { %s401_s17 = scalar_lea.hbm %s1476_s1, %s400_s23 }
 0x199   : > { %s411_s22 = sshll.u32 %s401_s17, 4  ;;  %s412_s22 = int_to_ptr.hbm [resolvable:$true] %s411_s22 }
 0x19a   : > { %s1115_s18 = sshra.s32 %s412_s22, 4  ;;  %s1116_s18 = int_to_ptr.hbm [resolvable:$true] %s1115_s18 }
 0x19b   : > { %s1117_s15 = scalar_lea.hbm %s1116_s18, 1  ;;  %p1120_p6 = scmp.lt.s32.totalorder %s1116_s18, %s1476_s1 }
 0x19c   : > { %p1118_p3 = scmp.ne.s32.totalorder %s1116_s18, %s1117_s15  ;;  %p1121_p7 = scmp.lt.s32.totalorder %s1372_s24, %s1117_s15 }
 0x19e   : > { %p1122_p8 = por %p1121_p7, %p1120_p6 }
 0x1a0   : > { %p1123_p9 = pnand %p1122_p8, %p1118_p3 }
 0x1a2   : > { %1126 = shalt.err (!%p1123_p9)  }
 0x1a3   : > { %416 = dma.hbm_to_vmem [thread:$0]  %s412_s22, 16, %s414_s25, [#allocation3 + $0x7]  ;;  %v872_v48 = vld [vmem:[%s1481_s6] ss:$0 sm:$0xff] }
 0x1c7   : > { %v569_v49 = vpop.f32.mrf.mxu1 }
 0x1c8   : > { %v570_v50 = vadd.f32 %v872_v48, %v569_v49 }
 0x1ca   : > { %v573_v51 = vmax.f32 %v570_v50, 0.0 }
 0x1cf   : > { %v571_v52 = vpop.f32.mrf.mxu1 }
 0x1d0   : > { %1165 = dma.done.wait [#allocation3], 16 }
 0x1d1   : > { %1166 = vsyncadd [#allocation3], 4294967280 }
 0x1d2   : > { %1167 = dma.done.wait [#allocation3 + $0x1], 16 }
 0x1d3   : > { %1168 = vsyncadd [#allocation3 + $0x1], 4294967280 }
 0x1d4   : > { %1169 = dma.done.wait [#allocation3 + $0x2], 16 }
 0x1d5   : > { %1170 = vsyncadd [#allocation3 + $0x2], 4294967280 }
 0x1d6   : > { %1171 = dma.done.wait [#allocation3 + $0x3], 16 }
 0x1d7   : > { %1172 = vsyncadd [#allocation3 + $0x3], 4294967280 }
 0x1d8   : > { %1173 = dma.done.wait [#allocation3 + $0x4], 16 }
 0x1d9   : > { %1174 = vsyncadd [#allocation3 + $0x4], 4294967280 }
 0x1da   : > { %1175 = dma.done.wait [#allocation3 + $0x5], 16 }
 0x1db   : > { %1176 = vsyncadd [#allocation3 + $0x5], 4294967280 }
 0x1dc   : > { %1177 = dma.done.wait [#allocation3 + $0x6], 16 }
 0x1dd   : > { %1178 = vsyncadd [#allocation3 + $0x6], 4294967280 }
 0x1de   : > { %1179 = dma.done.wait [#allocation3 + $0x7], 16 }
 0x1df   : > { %1180 = vsyncadd [#allocation3 + $0x7], 4294967280  ;;  %600 = vst [vmem:[%s1393_s14 + $0x8] sm:$0x3] %v573_v51  ;;  %v598_v53 = vld [vmem:[#allocation2] sm:$0xff] }
 0x1e0   : > { %599 = vst [vmem:[%s1393_s14] sm:$0xff] %v598_v53 }
 0x1e1 PF: > { %p26_p10 = scmp.ge.s32.totalorder %s1298_s16, 4   ;;  %s1489_s28 = smov %s1187_s29 }
 0x1e2   : > { %s1490_s29 = smov %s1191_s30  ;;  %s1491_s30 = smov %s1308_s21 }
 0x1e3   : > { %s1492_s8 = smov %s1298_s16  ;;  %28 = sbr.rel (!%p26_p10) target bundleno = 10 (0xa), region = 146 }
 0x1e8   :  { %622 = vsyncpa [#allocation7], 1 }
 0x1e9   :  { %624 = vsyncpa [#allocation7 + $0x1], 1 }
 0x1ea   :  { %625 = vsyncpa [#allocation9], 1 }
 0x1eb   :  { %626 = vsyncmov [#allocation3] }
 0x1ee   :  { %s627_s24 = vpop.sfrf %626 }
 0x1ef   :  { %p789_p1 = scmp.ne.s32.totalorder %s627_s24, 0 }
 0x1f1   :  { %631 = shalt.err (%p789_p1)  }
 0x1f2   :  { %633 = vsyncmov [#allocation3 + $0x1] }
 0x1f5   :  { %s634_s14 = vpop.sfrf %633 }
 0x1f6   :  { %p790_p4 = scmp.ne.s32.totalorder %s634_s14, 0 }
 0x1f8   :  { %638 = shalt.err (%p790_p4)  }
 0x1f9   :  { %640 = vsyncmov [#allocation3 + $0x2] }
 0x1fc   :  { %s641_s23 = vpop.sfrf %640 }
 0x1fd   :  { %p791_p5 = scmp.ne.s32.totalorder %s641_s23, 0 }
 0x1ff   :  { %645 = shalt.err (%p791_p5)  }
 0x200   :  { %647 = vsyncmov [#allocation3 + $0x3] }
 0x203   :  { %s648_s21 = vpop.sfrf %647 }
 0x204   :  { %p792_p11 = scmp.ne.s32.totalorder %s648_s21, 0 }
 0x206   :  { %652 = shalt.err (%p792_p11)  }
 0x207   :  { %654 = vsyncmov [#allocation3 + $0x4] }
 0x20a   :  { %s655_s1 = vpop.sfrf %654 }
 0x20b   :  { %p793_p12 = scmp.ne.s32.totalorder %s655_s1, 0 }
 0x20d   :  { %659 = shalt.err (%p793_p12)  }
 0x20e   :  { %661 = vsyncmov [#allocation3 + $0x5] }
 0x211   :  { %s662_s3 = vpop.sfrf %661 }
 0x212   :  { %p794_p13 = scmp.ne.s32.totalorder %s662_s3, 0 }
 0x214   :  { %666 = shalt.err (%p794_p13)  }
 0x215   :  { %668 = vsyncmov [#allocation3 + $0x6] }
 0x218   :  { %s669_s4 = vpop.sfrf %668 }
 0x219   :  { %p795_p0 = scmp.ne.s32.totalorder %s669_s4, 0 }
 0x21b   :  { %673 = shalt.err (%p795_p0)  }
 0x21c   :  { %675 = vsyncmov [#allocation3 + $0x7] }
 0x21f   :  { %s676_s5 = vpop.sfrf %675 }
 0x220   :  { %p796_p2 = scmp.ne.s32.totalorder %s676_s5, 0 }
 0x222   :  { %680 = shalt.err (%p796_p2)  }

</bundles_post_ra>
